<compile_context>
chip_gen: v7x
topology: tpu7x:2x2x1
jax: 0.10.0
libtpu: 0.0.40
codegen_flags: <defaults>
</compile_context>

<pallas_src>
import functools

import jax
import jax.numpy as jnp
from jax.experimental import pallas as pl
from jax.experimental.pallas import tpu as pltpu


def dqn_kernel(x_ref, w1_ref, b1_ref, w2_ref, b2_ref, w3_ref, b3_ref, out_ref):
    cdt = w1_ref.dtype  # MXU operand dtype (bf16 by default, f32 for the exact path)
    # fc1 + ReLU  (MXU matmul, f32 accumulation; bias add / ReLU in f32 on the VPU)
    h1 = jnp.dot(x_ref[...], w1_ref[...], preferred_element_type=jnp.float32)
    h1 = jnp.maximum(h1 + b1_ref[...], 0.0)
    # fc2 + ReLU
    h2 = jnp.dot(h1.astype(cdt), w2_ref[...], preferred_element_type=jnp.float32)
    h2 = jnp.maximum(h2 + b2_ref[...], 0.0)
    # fc3 (no activation) — narrow Q-head store (masked vst; vst count is the same either way)
    out_ref[...] = (
        jnp.dot(h2.astype(cdt), w3_ref[...], preferred_element_type=jnp.float32) + b3_ref[...]
    )


def _round_up(n, m):
    return ((n + m - 1) // m) * m


@functools.partial(jax.jit, static_argnames=("block_batch", "compute_dtype"))
def dqn_forward(x, w1, b1, w2, b2, w3, b3, *, block_batch=8192, compute_dtype=jnp.bfloat16):
    batch, input_size = x.shape
    output_size = w3.shape[1]

    # Streamed activations + (tiny, VMEM-resident) weights in the compute dtype; biases in f32
    # since they are added to the f32 accumulator.
    xc = x.astype(compute_dtype)
    w1c, w2c, w3c = (w.astype(compute_dtype) for w in (w1, w2, w3))
    b1c, b2c, b3c = (b.astype(jnp.float32) for b in (b1, b2, b3))

    # Batch tile: ~half the batch (so grid >= 2 and both v7x TensorCores get work), capped at
    # block_batch, rounded to the sublane-packing granularity of the compute dtype.
    sub = 16 if compute_dtype == jnp.bfloat16 else 8
    tb = max(sub, min(block_batch, _round_up((batch + 1) // 2, sub)))
    grid = ((batch + tb - 1) // tb,)  # ragged last tile handled by Pallas masking

    return pl.pallas_call(
        dqn_kernel,
        out_shape=jax.ShapeDtypeStruct((batch, output_size), jnp.float32),
        grid=grid,
        in_specs=[
            # activations: streamed tile of the batch
            pl.BlockSpec((tb, input_size), lambda i: (i, 0)),
            # weights / biases: full arrays, constant index_map -> DMA'd once, stay in VMEM
            pl.BlockSpec(w1c.shape, lambda i: (0, 0)),
            pl.BlockSpec(b1c.shape, lambda i: (0, 0)),
            pl.BlockSpec(w2c.shape, lambda i: (0, 0)),
            pl.BlockSpec(b2c.shape, lambda i: (0, 0)),
            pl.BlockSpec(w3c.shape, lambda i: (0, 0)),
            pl.BlockSpec(b3c.shape, lambda i: (0, 0)),
        ],
        out_specs=pl.BlockSpec((tb, output_size), lambda i: (i, 0)),
        compiler_params=pltpu.CompilerParams(
            dimension_semantics=("parallel",),  # batch axis is embarrassingly parallel
        ),
    )(xc, w1c, b1c, w2c, b2c, w3c, b3c)


def init_dqn_params(key, input_size, hidden_size, output_size):
    """PyTorch nn.Linear default init: U(-1/sqrt(fan_in), 1/sqrt(fan_in)).
    Weights returned pre-transposed to (in, out)."""
    keys = jax.random.split(key, 6)

    def linear(kw, kb, fan_in, fan_out):
        bound = 1.0 / jnp.sqrt(fan_in)
        w = jax.random.uniform(kw, (fan_in, fan_out), jnp.float32, -bound, bound)
        b = jax.random.uniform(kb, (1, fan_out), jnp.float32, -bound, bound)
        return w, b

    w1, b1 = linear(keys[0], keys[1], input_size, hidden_size)
    w2, b2 = linear(keys[2], keys[3], hidden_size, hidden_size)
    w3, b3 = linear(keys[4], keys[5], hidden_size, output_size)
    return w1, b1, w2, b2, w3, b3


def _reference(x, params):
    w1, b1, w2, b2, w3, b3 = params
    h = jnp.maximum(x @ w1 + b1, 0.0)
    h = jnp.maximum(h @ w2 + b2, 0.0)
    return h @ w3 + b3


if __name__ == "__main__":
    # Small shapes consistent with the DQN module: state vector -> hidden -> Q-values.
    batch = 32
    input_size = 16
    hidden_size = 32
    output_size = 4

    key = jax.random.PRNGKey(0)
    k_x, k_x2, k_p = jax.random.split(key, 3)
    params = init_dqn_params(k_p, input_size, hidden_size, output_size)

    x = jax.random.normal(k_x, (batch, input_size), jnp.float32)
    ref = _reference(x, params)

    # Exact-semantics check: f32 compute path, tight tolerance.
    out_f32 = jax.block_until_ready(dqn_forward(x, *params, compute_dtype=jnp.float32))
    assert out_f32.shape == (batch, output_size)
    assert jnp.allclose(out_f32, ref, atol=1e-5, rtol=1e-5)

    # Default bf16 compute path (f32 accumulation): looser tolerance vs. the f32 reference.
    out_bf16 = jax.block_until_ready(dqn_forward(x, *params))
    assert out_bf16.shape == (batch, output_size)
    assert jnp.allclose(out_bf16, ref, atol=5e-2, rtol=5e-2)

    # Larger, non-tile-aligned batch (exercises grid >= 2 and the ragged last tile, no padding).
    big_batch = 1030
    xb = jax.random.normal(k_x2, (big_batch, input_size), jnp.float32)
    ref_b = _reference(xb, params)

    out_b_f32 = jax.block_until_ready(dqn_forward(xb, *params, compute_dtype=jnp.float32))
    assert out_b_f32.shape == (big_batch, output_size)
    assert jnp.allclose(out_b_f32, ref_b, atol=1e-4, rtol=1e-4)

    out_b = jax.block_until_ready(dqn_forward(xb, *params))
    assert out_b.shape == (big_batch, output_size)
    assert jnp.allclose(out_b, ref_b, atol=5e-2, rtol=5e-2)

    print("KERNEL_OK")
</pallas_src>

<mosaic_0001>
module attributes {stable_mosaic.version = 11 : i64} {
  func.func @dqn_kernel(%arg0: i32, %arg1: memref<16x16xf32, #tpu.memory_space<vmem>>, %arg2: memref<16x32xf32, #tpu.memory_space<vmem>>, %arg3: memref<1x32xf32, #tpu.memory_space<vmem>>, %arg4: memref<32x32xf32, #tpu.memory_space<vmem>>, %arg5: memref<1x32xf32, #tpu.memory_space<vmem>>, %arg6: memref<32x4xf32, #tpu.memory_space<vmem>>, %arg7: memref<1x4xf32, #tpu.memory_space<vmem>>, %arg8: memref<16x4xf32, #tpu.memory_space<vmem>>) attributes {dimension_semantics = [#tpu.dimension_semantics<parallel>], iteration_bounds = array<i64: 2>, scalar_prefetch = 0 : i64, scratch_operands = 0 : i64, tpu.core_type = #tpu.core_type<tc>, window_params = [{transform_indices = @transform_0, window_bounds = array<i64: 16, 16>}, {pipeline_mode = #tpu.pipeline_mode<synchronous>, transform_indices = @transform_1, window_bounds = array<i64: 16, 32>}, {pipeline_mode = #tpu.pipeline_mode<synchronous>, transform_indices = @transform_2, window_bounds = array<i64: 1, 32>}, {pipeline_mode = #tpu.pipeline_mode<synchronous>, transform_indices = @transform_3, window_bounds = array<i64: 32, 32>}, {pipeline_mode = #tpu.pipeline_mode<synchronous>, transform_indices = @transform_4, window_bounds = array<i64: 1, 32>}, {pipeline_mode = #tpu.pipeline_mode<synchronous>, transform_indices = @transform_5, window_bounds = array<i64: 32, 4>}, {pipeline_mode = #tpu.pipeline_mode<synchronous>, transform_indices = @transform_6, window_bounds = array<i64: 1, 4>}, {transform_indices = @transform_7, window_bounds = array<i64: 16, 4>}]} {
    %c0 = arith.constant 0 : index
    %c0_0 = arith.constant 0 : index
    %0 = vector.load %arg1[%c0, %c0_0] : memref<16x16xf32, #tpu.memory_space<vmem>>, vector<16x16xf32>
    %c0_1 = arith.constant 0 : index
    %c0_2 = arith.constant 0 : index
    %1 = vector.load %arg2[%c0_1, %c0_2] : memref<16x32xf32, #tpu.memory_space<vmem>>, vector<16x32xf32>
    %cst = arith.constant dense<0.000000e+00> : vector<16x32xf32>
    %2 = tpu.matmul %0, %1, %cst {dimension_numbers = #tpu.dot_dimension_numbers<[1], [0], [0], [1], [0, 0, 1, 1], [], []>} : vector<16x16xf32>, vector<16x32xf32>, vector<16x32xf32> -> vector<16x32xf32>
    %c0_3 = arith.constant 0 : index
    %c0_4 = arith.constant 0 : index
    %3 = vector.load %arg3[%c0_3, %c0_4] : memref<1x32xf32, #tpu.memory_space<vmem>>, vector<1x32xf32>
    %4 = vector.broadcast %3 : vector<1x32xf32> to vector<16x32xf32>
    %5 = arith.addf %2, %4 : vector<16x32xf32>
    %cst_5 = arith.constant 0.000000e+00 : f32
    %6 = vector.broadcast %cst_5 : f32 to vector<16x32xf32>
    %7 = arith.maximumf %5, %6 : vector<16x32xf32>
    %c0_6 = arith.constant 0 : index
    %c0_7 = arith.constant 0 : index
    %8 = vector.load %arg4[%c0_6, %c0_7] : memref<32x32xf32, #tpu.memory_space<vmem>>, vector<32x32xf32>
    %cst_8 = arith.constant dense<0.000000e+00> : vector<16x32xf32>
    %9 = tpu.matmul %7, %8, %cst_8 {dimension_numbers = #tpu.dot_dimension_numbers<[1], [0], [0], [1], [0, 0, 1, 1], [], []>} : vector<16x32xf32>, vector<32x32xf32>, vector<16x32xf32> -> vector<16x32xf32>
    %c0_9 = arith.constant 0 : index
    %c0_10 = arith.constant 0 : index
    %10 = vector.load %arg5[%c0_9, %c0_10] : memref<1x32xf32, #tpu.memory_space<vmem>>, vector<1x32xf32>
    %11 = vector.broadcast %10 : vector<1x32xf32> to vector<16x32xf32>
    %12 = arith.addf %9, %11 : vector<16x32xf32>
    %cst_11 = arith.constant 0.000000e+00 : f32
    %13 = vector.broadcast %cst_11 : f32 to vector<16x32xf32>
    %14 = arith.maximumf %12, %13 : vector<16x32xf32>
    %c0_12 = arith.constant 0 : index
    %c0_13 = arith.constant 0 : index
    %15 = vector.load %arg6[%c0_12, %c0_13] : memref<32x4xf32, #tpu.memory_space<vmem>>, vector<32x4xf32>
    %cst_14 = arith.constant dense<0.000000e+00> : vector<16x4xf32>
    %16 = tpu.matmul %14, %15, %cst_14 {dimension_numbers = #tpu.dot_dimension_numbers<[1], [0], [0], [1], [0, 0, 1, 1], [], []>} : vector<16x32xf32>, vector<32x4xf32>, vector<16x4xf32> -> vector<16x4xf32>
    %c0_15 = arith.constant 0 : index
    %c0_16 = arith.constant 0 : index
    %17 = vector.load %arg7[%c0_15, %c0_16] : memref<1x4xf32, #tpu.memory_space<vmem>>, vector<1x4xf32>
    %18 = vector.broadcast %17 : vector<1x4xf32> to vector<16x4xf32>
    %19 = arith.addf %16, %18 : vector<16x4xf32>
    %c0_17 = arith.constant 0 : index
    %c0_18 = arith.constant 0 : index
    %20 = vector.load %arg8[%c0_17, %c0_18] : memref<16x4xf32, #tpu.memory_space<vmem>>, vector<16x4xf32>
    tpu.vector_store %arg8[%c0_17, %c0_18], %19 {strides = array<i32>} : memref<16x4xf32, #tpu.memory_space<vmem>>, vector<16x4xf32>,
    return
  }
  func.func @transform_0(%arg0: i32) -> (i32, i32) {
    %c0_i32 = arith.constant 0 : i32
    %c0_i32_0 = arith.constant 0 : i32
    return %arg0, %c0_i32 : i32, i32
  }
  func.func @transform_1(%arg0: i32) -> (i32, i32) {
    %c0_i32 = arith.constant 0 : i32
    %c0_i32_0 = arith.constant 0 : i32
    %c0_i32_1 = arith.constant 0 : i32
    return %c0_i32, %c0_i32_0 : i32, i32
  }
  func.func @transform_2(%arg0: i32) -> (i32, i32) {
    %c0_i32 = arith.constant 0 : i32
    %c0_i32_0 = arith.constant 0 : i32
    %c0_i32_1 = arith.constant 0 : i32
    return %c0_i32, %c0_i32_0 : i32, i32
  }
  func.func @transform_3(%arg0: i32) -> (i32, i32) {
    %c0_i32 = arith.constant 0 : i32
    %c0_i32_0 = arith.constant 0 : i32
    %c0_i32_1 = arith.constant 0 : i32
    return %c0_i32, %c0_i32_0 : i32, i32
  }
  func.func @transform_4(%arg0: i32) -> (i32, i32) {
    %c0_i32 = arith.constant 0 : i32
    %c0_i32_0 = arith.constant 0 : i32
    %c0_i32_1 = arith.constant 0 : i32
    return %c0_i32, %c0_i32_0 : i32, i32
  }
  func.func @transform_5(%arg0: i32) -> (i32, i32) {
    %c0_i32 = arith.constant 0 : i32
    %c0_i32_0 = arith.constant 0 : i32
    %c0_i32_1 = arith.constant 0 : i32
    return %c0_i32, %c0_i32_0 : i32, i32
  }
  func.func @transform_6(%arg0: i32) -> (i32, i32) {
    %c0_i32 = arith.constant 0 : i32
    %c0_i32_0 = arith.constant 0 : i32
    %c0_i32_1 = arith.constant 0 : i32
    return %c0_i32, %c0_i32_0 : i32, i32
  }
  func.func @transform_7(%arg0: i32) -> (i32, i32) {
    %c0_i32 = arith.constant 0 : i32
    %c0_i32_0 = arith.constant 0 : i32
    return %arg0, %c0_i32 : i32, i32
  }
}

</mosaic_0001>

<bundles_post_ra>
// kernel: dqn_forward.1
= control target key start
LH: loop header
LB: loop body
LE: loop exit
PB: predicated region body
PF: predicated region fallthrough
CT: control target
= control target key end

     0   :  { %s764_s24 = smov 0   ;;  %s831_s0 = inlined_call_operand.vmem [shape: f32[32,16], index: 0, kind: input, shape index: {}]   ;;  %s832_s1 = inlined_call_operand.vmem [shape: f32[16,32], index: 1, kind: input, shape index: {}]   ;;  %s833_s2 = inlined_call_operand.vmem [shape: f32[1,32], index: 2, kind: input, shape index: {}]   ;;  %s834_s3 = inlined_call_operand.vmem [shape: f32[32,32], index: 3, kind: input, shape index: {}]   ;;  %s835_s4 = inlined_call_operand.vmem [shape: f32[1,32], index: 4, kind: input, shape index: {}]   ;;  %s836_s5 = inlined_call_operand.vmem [shape: f32[32,4], index: 5, kind: input, shape index: {}]   ;;  %s837_s6 = inlined_call_operand.vmem [shape: f32[1,4], index: 6, kind: input, shape index: {}]   ;;  %s838_s7 = inlined_call_operand.vmem [shape: f32[32,4], index: 7, kind: output, shape index: {}]  }
   0x1 LB: > { %s623_s25 = sadd.s32 4294967295, %s722_s24   ;;  %p627_p0 = scmp.ge.s32.totalorder %s722_s24, 1  ;;  %s722_s24 = sphi %s764_s24, %s17_s24  }
   0x2   : > { %p238_p1 = scmp.lt.s32.totalorder %s722_s24, 3 }
   0x4   : > { %p239_p2 = pnand %p627_p0, %p238_p1 }
   0x5   : > { %v284_v0 = vld [vmem:[%s832_s1] sm:$0xff] (!%p239_p2)  ;;  %v285_v1 = vld [vmem:[%s832_s1 + $0x8] sm:$0xff] (!%p239_p2)  ;;  %s628_s30 = sshll.u32 (!%p239_p2), %s623_s25, 1  ;;  %vm293_vm0 = vcmask (!%p239_p2), 130048   ;;  %v379_v8 = vld [vmem:[%s834_s3 + $0x10] sm:$0xff] (!%p239_p2)  ;;  %vm388_vm1 = vcmask (!%p239_p2), 261120  }
   0x6   : > { %242 = sbr.rel (%p239_p2) target bundleno = 670 (0x29e), region = 48  ;;  %v377_v2 = vld [vmem:[%s834_s3] sm:$0xff] (!%p239_p2)  ;;  %v688_v3 = vpack.c.bf16 (!%p239_p2), %v285_v1, %v284_v0  ;;  %p271_p3 = scmp.lt.s32.totalorder (!%p239_p2), %s628_s30, 3  ;;  %v378_v4 = vld [vmem:[%s834_s3 + $0x8] sm:$0xff] (!%p239_p2)  ;;  %v380_v9 = vld [vmem:[%s834_s3 + $0x18] sm:$0xff] (!%p239_p2)  ;;  %vm564_vm2 = vcmask (!%p239_p2), 31744  }
   0x7   : > { %v692_v5 = vpack.c.bf16 (!%p239_p2), %v378_v4, %v377_v2  ;;  %v696_v10 = vpack.c.bf16 (!%p239_p2), %v380_v9, %v379_v8  ;;  %v472_v11 = vld [vmem:[%s836_s5] sm:$0xff] (!%p239_p2)  ;;  %v473_v12 = vld [vmem:[%s836_s5 + $0x8] sm:$0xff] (!%p239_p2)  ;;  %v474_v21 = vld [vmem:[%s836_s5 + $0x10] sm:$0xff] (!%p239_p2) }
   0x8   : > { %689 = vmatprep.subr.bf16.mxu0 (!%p239_p2), %v688_v3  ;;  %v700_v13 = vpack.c.bf16 (!%p239_p2), %v473_v12, %v472_v11  ;;  %v632_v14 = vld [vmem:[%s833_s2] ss:$0 sm:$0xff] (!%p239_p2)  ;;  %v475_v22 = vld [vmem:[%s836_s5 + $0x18] sm:$0xff] (!%p239_p2) }
   0x9   : > { %691 = vmatpush3.bf16.msra.mxu0 (!%p239_p2), %v688_v3  ;;  %693 = vmatprep.subr.bf16.mxu1 (!%p239_p2), %v692_v5  ;;  %v704_v23 = vpack.c.bf16 (!%p239_p2), %v475_v22, %v474_v21  ;;  %v635_v24 = vld [vmem:[%s835_s4] ss:$0 sm:$0xff] (!%p239_p2) }
   0xa   : > { %695 = vmatpush3.bf16.msra.mxu1 (!%p239_p2), %v692_v5  ;;  %701 = vmatprep.subr.bf16.mxu0 (!%p239_p2), %v700_v13  ;;  %v638_v31 = vld [vmem:[%s837_s6] ss:$0 sm:$0xff] (!%p239_p2) }
   0xb   : > { %697 = vmatprep.subr.bf16.mxu1 (!%p239_p2), %v696_v10 }
   0xd   : > { %s840_s30 = smov (!%p271_p3, %s628_s30), 3 }
   0xe   : > { %s629_s12 = sshll.u32 %s840_s30, 3  ;;  %699 = vmatpush3.bf16.msra.mxu1 %v696_v10 }
   0xf   : > { %s274_s15 = scalar_lea.vmem %s831_s0, %s629_s12  ;;  %s280_s16 = scalar_lea.vmem %s838_s7, %s629_s12 }
  0x10   : > { %v282_v6 = vld [vmem:[%s274_s15] sm:$0xff]  ;;  %v283_v7 = vld [vmem:[%s274_s15 + $0x8] sm:$0xff] }
  0x11   : > { %663 = vmatprep.mubr.msk.f32.mxu0 %vm293_vm0, %v282_v6 }
  0x12   : > { %664 = vmatmul.mubr.msk.f32.vlgmr.msra.gmra.mrb[0].mxu0 %vm293_vm0, %v283_v7 }
  0x13   : > { %703 = vmatpush3.bf16.msra.mxu0 %v700_v13 }
  0x14   : > { %705 = vmatprep.subr.bf16.mxu0 %v704_v23 }
  0x17   : > { %707 = vmatpush3.bf16.msra.mxu0 %v704_v23 }
  0xe5   : > { %v665_v15 = vpop.f32.mrb[0].mxu0 }
  0xe6   : > { %v372_v16 = vadd.f32 %v665_v15, %v632_v14  ;;  %v366_v17 = vpop.f32.mrb[1].mxu0 }
  0xe7   : > { %v367_v18 = vadd.f32 %v632_v14, %v366_v17 }
  0xe8   : > { %v376_v20 = vmax.f32 %v372_v16, 0.0 }
  0xe9   : > { %v375_v19 = vmax.f32 %v367_v18, 0.0 }
  0xeb   : > { %674 = vmatprep.mubr.msk.f32.mxu1 %vm388_vm1, %v375_v19 }
  0xec   : > { %675 = vmatmul.mubr.msk.f32.vlgmr.msra.gmra.mrb[0].mxu1 %vm388_vm1, %v376_v20 }
 0x1bf   : > { %v676_v25 = vpop.f32.mrb[0].mxu1 }
 0x1c0   : > { %v467_v26 = vadd.f32 %v676_v25, %v635_v24  ;;  %v461_v27 = vpop.f32.mrb[1].mxu1 }
 0x1c1   : > { %v462_v28 = vadd.f32 %v635_v24, %v461_v27 }
 0x1c2   : > { %v471_v30 = vmax.f32 %v467_v26, 0.0 }
 0x1c3   : > { %v470_v29 = vmax.f32 %v462_v28, 0.0 }
 0x1c5   : > { %685 = vmatprep.mubr.msk.f32.mxu0 %vm388_vm1, %v470_v29 }
 0x1c6   : > { %686 = vmatmul.mubr.msk.f32.vlgmr.msra.gmra.mrb[2].mxu0 %vm388_vm1, %v471_v30 }
 0x299   : > { %v687_v32 = vpop.f32.mrb[2].mxu0 }
 0x29a   : > { %v555_v33 = vpop.f32.mrb[3].mxu0  ;;  %v561_v35 = vadd.f32 %v687_v32, %v638_v31 }
 0x29b   : > { %v556_v34 = vadd.f32 %v638_v31, %v555_v33 }
 0x29c   : > { %566 = vst.msk [vmem:[%s280_s16 + $0x8] sm:$0xff] %vm564_vm2, %v561_v35 }
 0x29d   : > { %565 = vst.msk [vmem:[%s280_s16] sm:$0xff] %vm564_vm2, %v556_v34 }
 0x29e PF: > { %s17_s24 = sadd.s32 1, %s722_s24  }
 0x29f   : > { %p14_p4 = scmp.ge.s32.totalorder %s17_s24, 4  }
 0x2a1   :  { %16 = sbr.rel (!%p14_p4) target bundleno = 1 (0x1), region = 78 }

</bundles_post_ra>
